<compile_context>
chip_gen: v6e
topology: v6e:2x2x1
jax: 0.10.0
libtpu: 0.0.40
codegen_flags: <defaults>
</compile_context>

<pallas_src>
import math

import jax
import jax.numpy as jnp
from jax.experimental import pallas as pl
from jax.experimental.pallas import tpu as pltpu


def _tensor_network_kernel(ein_ref, wfused_ref, seg_ref, wbt_ref, bias_ref, out_ref):
    """One batch-tile of SimGNN tensor-network scores.

    ein_ref    : (bt, 2D)          rows [e1 | e2]
    wfused_ref : (2D, 2*T*D)       [[W2d, 0], [0, TileMap]]   (resident across grid)
    seg_ref    : (T*D, T)          segmented-sum matrix        (resident across grid)
    wbt_ref    : (2D, T)           W_block^T                   (resident across grid)
    bias_ref   : (1, T)
    out_ref    : (bt, T)
    """
    td = seg_ref.shape[0]  # T*D

    ein = ein_ref[...]
    # MXU #1: m[:, t*D+j] = sum_i e1[i] W[i,j,t]   (first T*D columns, from W2d block)
    #         m[:, T*D + t*D + j] = e2[j]          (second T*D columns, from TileMap block)
    m = jnp.dot(ein, wfused_ref[...], preferred_element_type=jnp.float32)

    # VPU: bilinear partial times the e2 tile; both slices are 128-lane aligned (td = 4*128).
    p = m[:, :td] * m[:, td:]

    # MXU #2: segmented lane reduce over j per tensor-neuron t.
    # MXU #3: block term  [e1|e2] @ W_block^T.
    s = (jnp.dot(p, seg_ref[...], preferred_element_type=jnp.float32)
         + jnp.dot(ein, wbt_ref[...], preferred_element_type=jnp.float32)
         + bias_ref[...])
    out_ref[...] = jnp.maximum(s, 0.0)


def _prepare_weights(weight_matrix, weight_matrix_block, bias):
    """One-time, data-independent weight repacking (host side)."""
    D = weight_matrix.shape[0]
    T = weight_matrix.shape[2]
    f32 = jnp.float32

    # Lane-dense slab: W2d[i, t*D + j] = W[i, j, t]
    w2d = jnp.transpose(weight_matrix, (0, 2, 1)).reshape(D, T * D).astype(f32)

    # TileMap[j, t*D + j'] = [j == j']  -> e2 @ TileMap produces tile(e2, T) on the MXU.
    tilemap = jnp.tile(jnp.eye(D, dtype=f32), (1, T))                   # (D, T*D)

    zeros_td = jnp.zeros((D, T * D), dtype=f32)
    wfused = jnp.concatenate(
        [jnp.concatenate([w2d, zeros_td], axis=1),                      # e1 rows
         jnp.concatenate([zeros_td, tilemap], axis=1)],                 # e2 rows
        axis=0)                                                         # (2D, 2*T*D)

    # SegSum[t*D + j, t'] = [t == t']  -> segmented lane reduce as an MXU matmul.
    seg = jnp.repeat(jnp.eye(T, dtype=f32), D, axis=0)                  # (T*D, T)

    wbt = weight_matrix_block.T.astype(f32)                             # (2D, T)
    bias_row = bias.reshape(1, T).astype(f32)
    return wfused, seg, wbt, bias_row


def tensor_network_forward_batched(e1_rows, e2_rows, weight_matrix,
                                   weight_matrix_block, bias, *, block_b=256):
    """Batched forward: e1_rows, e2_rows are (B, D); returns (B, T)."""
    B, D = e1_rows.shape
    T = weight_matrix.shape[2]

    wfused, seg, wbt, bias_row = _prepare_weights(weight_matrix, weight_matrix_block, bias)

    # Batch tile: clamp to round_up(B, 8) for small B (single grid step), otherwise a
    # multiple of 8 (f32 sublane); default 256 fills the v6e/v7x MXU M dimension and is a
    # multiple of 128 for v5e.
    b_ceil8 = ((B + 7) // 8) * 8
    bt = min(int(block_b), b_ceil8)
    bt = max(8, (bt // 8) * 8)
    b_pad = pl.cdiv(B, bt) * bt

    if b_pad != B:
        pad = b_pad - B
        e1_rows = jnp.pad(e1_rows, ((0, pad), (0, 0)))
        e2_rows = jnp.pad(e2_rows, ((0, pad), (0, 0)))

    # Layout plumbing only (no input-dependent arithmetic):
    ein = jnp.concatenate([e1_rows, e2_rows], axis=1).astype(jnp.float32)   # (b_pad, 2D)

    td = T * D
    grid = (b_pad // bt,)

    out = pl.pallas_call(
        _tensor_network_kernel,
        out_shape=jax.ShapeDtypeStruct((b_pad, T), jnp.float32),
        grid=grid,
        in_specs=[
            pl.BlockSpec((bt, 2 * D), lambda b: (b, 0)),
            pl.BlockSpec((2 * D, 2 * td), lambda b: (0, 0)),  # weights: same block every
            pl.BlockSpec((td, T), lambda b: (0, 0)),          # step -> resident in VMEM
            pl.BlockSpec((2 * D, T), lambda b: (0, 0)),
            pl.BlockSpec((1, T), lambda b: (0, 0)),
        ],
        out_specs=pl.BlockSpec((bt, T), lambda b: (b, 0)),
        compiler_params=pltpu.CompilerParams(
            dimension_semantics=("parallel",),            # v7x: shard batch over both TCs
            vmem_limit_bytes=48 * 1024 * 1024,            # headroom for bt up to ~4K rows
        ),
    )(ein, wfused, seg, wbt, bias_row)

    return out[:B]


def tensor_network_forward(embedding_1, embedding_2, weight_matrix,
                           weight_matrix_block, bias):
    """Module-parity entry point: embeddings are (D, 1) columns; returns (T, 1).

    Single pairs go through the batched path, which pads the batch to 8 rows (one grid
    step) rather than issuing an M=1 matvec.
    """
    out = tensor_network_forward_batched(embedding_1.T, embedding_2.T, weight_matrix,
                                         weight_matrix_block, bias)       # (1, T)
    return out.T                                                          # (T, 1)


def _reference_forward(e1, e2, W, Wb, b):
    """Pure-JAX transcription of the PyTorch forward (single pair, (D,1) columns)."""
    D = e1.shape[0]
    T = W.shape[2]
    scoring = (e1.T @ W.reshape(D, D * T)).reshape(D, T)
    scoring = scoring.T @ e2
    combined = jnp.concatenate([e1, e2], axis=0)
    block = Wb @ combined
    return jnp.maximum(scoring + block + b, 0.0)


def _reference_batched(E1, E2, W, Wb, b):
    scoring = jnp.einsum('bi,ijt,bj->bt', E1, W, E2)
    block = jnp.concatenate([E1, E2], axis=1) @ Wb.T
    return jnp.maximum(scoring + block + b.reshape(1, -1), 0.0)


if __name__ == "__main__":
    # Small shapes consistent with the module: input_dim (final_features) = 32,
    # tensor_neurons = 16.
    D, T = 32, 16

    key = jax.random.PRNGKey(0)
    k1, k2, k3, k4, k5, k6, k7 = jax.random.split(key, 7)

    # Deterministic Xavier-uniform-style init (synthetic; not a checkpoint load).
    bw = math.sqrt(6.0 / (D + D * T))
    weight_matrix = jax.random.uniform(k3, (D, D, T), jnp.float32, -bw, bw)
    bwb = math.sqrt(6.0 / (T + 2 * D))
    weight_matrix_block = jax.random.uniform(k4, (T, 2 * D), jnp.float32, -bwb, bwb)
    bb = math.sqrt(6.0 / (T + 1))
    bias = jax.random.uniform(k5, (T, 1), jnp.float32, -bb, bb)

    # --- Test 1: small batch -> tile clamps to round_up(B, 8), single grid step. ---
    B1 = 16
    E1 = jax.random.normal(k1, (B1, D), dtype=jnp.float32)
    E2 = jax.random.normal(k2, (B1, D), dtype=jnp.float32)
    out_1 = jax.block_until_ready(
        tensor_network_forward_batched(E1, E2, weight_matrix, weight_matrix_block, bias))
    ref_1 = _reference_batched(E1, E2, weight_matrix, weight_matrix_block, bias)
    if not jnp.allclose(out_1, ref_1, atol=1e-4, rtol=1e-4):
        raise AssertionError("Batched Pallas kernel (small batch) does not match reference")

    # --- Test 2: batch not divisible by the tile -> multi-step grid + padding discard. ---
    B2 = 200
    E1b = jax.random.normal(k6, (B2, D), dtype=jnp.float32)
    E2b = jax.random.normal(k7, (B2, D), dtype=jnp.float32)
    out_2 = jax.block_until_ready(
        tensor_network_forward_batched(E1b, E2b, weight_matrix, weight_matrix_block, bias,
                                       block_b=128))
    ref_2 = _reference_batched(E1b, E2b, weight_matrix, weight_matrix_block, bias)
    if not jnp.allclose(out_2, ref_2, atol=1e-4, rtol=1e-4):
        raise AssertionError("Batched Pallas kernel (padded batch) does not match reference")

    # --- Test 3: module-parity single-pair path ((D,1) columns -> (T,1)). ---
    e1 = E1[0].reshape(D, 1)
    e2 = E2[0].reshape(D, 1)
    out_3 = jax.block_until_ready(
        tensor_network_forward(e1, e2, weight_matrix, weight_matrix_block, bias))
    ref_3 = _reference_forward(e1, e2, weight_matrix, weight_matrix_block, bias)
    if not jnp.allclose(out_3, ref_3, atol=1e-4, rtol=1e-4):
        raise AssertionError("Single-pair Pallas kernel output does not match reference")

    print("KERNEL_OK")
</pallas_src>

<mosaic_0001>
module attributes {stable_mosaic.version = 11 : i64} {
  func.func @_tensor_network_kernel(%arg0: i32, %arg1: memref<16x64xf32, #tpu.memory_space<vmem>>, %arg2: memref<64x1024xf32, #tpu.memory_space<vmem>>, %arg3: memref<512x16xf32, #tpu.memory_space<vmem>>, %arg4: memref<64x16xf32, #tpu.memory_space<vmem>>, %arg5: memref<1x16xf32, #tpu.memory_space<vmem>>, %arg6: memref<16x16xf32, #tpu.memory_space<vmem>>) attributes {dimension_semantics = [#tpu.dimension_semantics<parallel>], iteration_bounds = array<i64: 1>, scalar_prefetch = 0 : i64, scratch_operands = 0 : i64, tpu.core_type = #tpu.core_type<tc>, window_params = [{transform_indices = @transform_0, window_bounds = array<i64: 16, 64>}, {pipeline_mode = #tpu.pipeline_mode<synchronous>, transform_indices = @transform_1, window_bounds = array<i64: 64, 1024>}, {pipeline_mode = #tpu.pipeline_mode<synchronous>, transform_indices = @transform_2, window_bounds = array<i64: 512, 16>}, {pipeline_mode = #tpu.pipeline_mode<synchronous>, transform_indices = @transform_3, window_bounds = array<i64: 64, 16>}, {pipeline_mode = #tpu.pipeline_mode<synchronous>, transform_indices = @transform_4, window_bounds = array<i64: 1, 16>}, {transform_indices = @transform_5, window_bounds = array<i64: 16, 16>}]} {
    %c0 = arith.constant 0 : index
    %c0_0 = arith.constant 0 : index
    %0 = vector.load %arg1[%c0, %c0_0] : memref<16x64xf32, #tpu.memory_space<vmem>>, vector<16x64xf32>
    %c0_1 = arith.constant 0 : index
    %c0_2 = arith.constant 0 : index
    %1 = vector.load %arg2[%c0_1, %c0_2] : memref<64x1024xf32, #tpu.memory_space<vmem>>, vector<64x1024xf32>
    %cst = arith.constant dense<0.000000e+00> : vector<16x1024xf32>
    %2 = tpu.matmul %0, %1, %cst {dimension_numbers = #tpu.dot_dimension_numbers<[1], [0], [0], [1], [0, 0, 1, 1], [], []>} : vector<16x64xf32>, vector<64x1024xf32>, vector<16x1024xf32> -> vector<16x1024xf32>
    %3 = vector.extract_strided_slice %2 {offsets = [0, 0], sizes = [16, 512], strides = [1, 1]} : vector<16x1024xf32> to vector<16x512xf32>
    %4 = vector.extract_strided_slice %2 {offsets = [0, 512], sizes = [16, 512], strides = [1, 1]} : vector<16x1024xf32> to vector<16x512xf32>
    %5 = arith.mulf %3, %4 : vector<16x512xf32>
    %c0_3 = arith.constant 0 : index
    %c0_4 = arith.constant 0 : index
    %6 = vector.load %arg3[%c0_3, %c0_4] : memref<512x16xf32, #tpu.memory_space<vmem>>, vector<512x16xf32>
    %cst_5 = arith.constant dense<0.000000e+00> : vector<16x16xf32>
    %7 = tpu.matmul %5, %6, %cst_5 {dimension_numbers = #tpu.dot_dimension_numbers<[1], [0], [0], [1], [0, 0, 1, 1], [], []>} : vector<16x512xf32>, vector<512x16xf32>, vector<16x16xf32> -> vector<16x16xf32>
    %c0_6 = arith.constant 0 : index
    %c0_7 = arith.constant 0 : index
    %8 = vector.load %arg4[%c0_6, %c0_7] : memref<64x16xf32, #tpu.memory_space<vmem>>, vector<64x16xf32>
    %cst_8 = arith.constant dense<0.000000e+00> : vector<16x16xf32>
    %9 = tpu.matmul %0, %8, %cst_8 {dimension_numbers = #tpu.dot_dimension_numbers<[1], [0], [0], [1], [0, 0, 1, 1], [], []>} : vector<16x64xf32>, vector<64x16xf32>, vector<16x16xf32> -> vector<16x16xf32>
    %10 = arith.addf %7, %9 : vector<16x16xf32>
    %c0_9 = arith.constant 0 : index
    %c0_10 = arith.constant 0 : index
    %11 = vector.load %arg5[%c0_9, %c0_10] : memref<1x16xf32, #tpu.memory_space<vmem>>, vector<1x16xf32>
    %12 = vector.broadcast %11 : vector<1x16xf32> to vector<16x16xf32>
    %13 = arith.addf %10, %12 : vector<16x16xf32>
    %cst_11 = arith.constant 0.000000e+00 : f32
    %14 = vector.broadcast %cst_11 : f32 to vector<16x16xf32>
    %15 = arith.maximumf %13, %14 : vector<16x16xf32>
    %c0_12 = arith.constant 0 : index
    %c0_13 = arith.constant 0 : index
    %16 = vector.load %arg6[%c0_12, %c0_13] : memref<16x16xf32, #tpu.memory_space<vmem>>, vector<16x16xf32>
    tpu.vector_store %arg6[%c0_12, %c0_13], %15 {strides = array<i32>} : memref<16x16xf32, #tpu.memory_space<vmem>>, vector<16x16xf32>,
    return
  }
  func.func @transform_0(%arg0: i32) -> (i32, i32) {
    %c0_i32 = arith.constant 0 : i32
    %c0_i32_0 = arith.constant 0 : i32
    return %arg0, %c0_i32 : i32, i32
  }
  func.func @transform_1(%arg0: i32) -> (i32, i32) {
    %c0_i32 = arith.constant 0 : i32
    %c0_i32_0 = arith.constant 0 : i32
    %c0_i32_1 = arith.constant 0 : i32
    return %c0_i32, %c0_i32_0 : i32, i32
  }
  func.func @transform_2(%arg0: i32) -> (i32, i32) {
    %c0_i32 = arith.constant 0 : i32
    %c0_i32_0 = arith.constant 0 : i32
    %c0_i32_1 = arith.constant 0 : i32
    return %c0_i32, %c0_i32_0 : i32, i32
  }
  func.func @transform_3(%arg0: i32) -> (i32, i32) {
    %c0_i32 = arith.constant 0 : i32
    %c0_i32_0 = arith.constant 0 : i32
    %c0_i32_1 = arith.constant 0 : i32
    return %c0_i32, %c0_i32_0 : i32, i32
  }
  func.func @transform_4(%arg0: i32) -> (i32, i32) {
    %c0_i32 = arith.constant 0 : i32
    %c0_i32_0 = arith.constant 0 : i32
    %c0_i32_1 = arith.constant 0 : i32
    return %c0_i32, %c0_i32_0 : i32, i32
  }
  func.func @transform_5(%arg0: i32) -> (i32, i32) {
    %c0_i32 = arith.constant 0 : i32
    %c0_i32_0 = arith.constant 0 : i32
    return %arg0, %c0_i32 : i32, i32
  }
}

</mosaic_0001>

<bundles_post_ra>
// kernel: tpu_custom_call.1
= control target key start
LH: loop header
LB: loop body
LE: loop exit
PB: predicated region body
PF: predicated region fallthrough
CT: control target
= control target key end

     0   :  { %vm87_vm0 = vcmask 523264   ;;  %v879_v34 = vmov 0.0   ;;  %s1365_s0 = inlined_call_operand.vmem [shape: f32[16,64], index: 0, kind: input, shape index: {}]   ;;  %s1366_s1 = inlined_call_operand.vmem [shape: f32[64,1024], index: 1, kind: input, shape index: {}]   ;;  %s1367_s2 = inlined_call_operand.vmem [shape: f32[512,16], index: 2, kind: input, shape index: {}]   ;;  %s1368_s3 = inlined_call_operand.vmem [shape: f32[64,16], index: 3, kind: input, shape index: {}]   ;;  %s1369_s4 = inlined_call_operand.vmem [shape: f32[1,16], index: 4, kind: input, shape index: {}]   ;;  %s1370_s5 = inlined_call_operand.hbm [shape: f32[16,16], index: 5, kind: output, shape index: {}]  }
   0x1   :  { %v80_v0 = vld [vmem:[%s1366_s1 + $0x1c8] sm:$0xff]  ;;  %v82_v1 = vld [vmem:[%s1366_s1 + $0x1d8] sm:$0xff]  ;;  %v79_v2 = vld [vmem:[%s1366_s1 + $0x1c0] sm:$0xff]  ;;  %158 = vmatprep.mubr.f32.mxu0 %v879_v34  ;;  %235 = vmatprep.mubr.f32.mxu1 %v879_v34 }
   0x2   :  { %110 = vmatprep.subr.mxu0 %v80_v0  ;;  %187 = vmatprep.subr.mxu1 %v82_v1  ;;  %v81_v3 = vld [vmem:[%s1366_s1 + $0x1d0] sm:$0xff]  ;;  %v72_v4 = vld [vmem:[%s1366_s1 + $0x188] sm:$0xff]  ;;  %v74_v5 = vld [vmem:[%s1366_s1 + $0x198] sm:$0xff] }
   0x3   :  { %111 = vmatpush1.msra.mxu0 %v79_v2  ;;  %188 = vmatpush1.msra.mxu1 %v81_v3  ;;  %v71_v6 = vld [vmem:[%s1366_s1 + $0x180] sm:$0xff]  ;;  %v73_v7 = vld [vmem:[%s1366_s1 + $0x190] sm:$0xff]  ;;  %v64_v8 = vld [vmem:[%s1366_s1 + $0x148] sm:$0xff] }
   0x4   :  { %112 = vmatprep.subr.mxu0 %v72_v4  ;;  %189 = vmatprep.subr.mxu1 %v74_v5  ;;  %v66_v9 = vld [vmem:[%s1366_s1 + $0x158] sm:$0xff]  ;;  %v63_v10 = vld [vmem:[%s1366_s1 + $0x140] sm:$0xff]  ;;  %v65_v11 = vld [vmem:[%s1366_s1 + $0x150] sm:$0xff] }
   0x5   :  { %113 = vmatpush1.msra.mxu0 %v71_v6  ;;  %190 = vmatpush1.msra.mxu1 %v73_v7  ;;  %v56_v12 = vld [vmem:[%s1366_s1 + $0x108] sm:$0xff]  ;;  %v58_v13 = vld [vmem:[%s1366_s1 + $0x118] sm:$0xff]  ;;  %v55_v14 = vld [vmem:[%s1366_s1 + $0x100] sm:$0xff] }
   0x6   :  { %114 = vmatprep.subr.mxu0 %v64_v8  ;;  %191 = vmatprep.subr.mxu1 %v66_v9  ;;  %v57_v15 = vld [vmem:[%s1366_s1 + $0x110] sm:$0xff]  ;;  %v48_v16 = vld [vmem:[%s1366_s1 + $0xc8] sm:$0xff]  ;;  %v50_v17 = vld [vmem:[%s1366_s1 + $0xd8] sm:$0xff] }
   0x7   :  { %115 = vmatpush1.msra.mxu0 %v63_v10  ;;  %192 = vmatpush1.msra.mxu1 %v65_v11  ;;  %v47_v18 = vld [vmem:[%s1366_s1 + $0xc0] sm:$0xff]  ;;  %v49_v19 = vld [vmem:[%s1366_s1 + $0xd0] sm:$0xff]  ;;  %v40_v20 = vld [vmem:[%s1366_s1 + $0x88] sm:$0xff] }
   0x8   :  { %116 = vmatprep.subr.mxu0 %v56_v12  ;;  %193 = vmatprep.subr.mxu1 %v58_v13  ;;  %v42_v21 = vld [vmem:[%s1366_s1 + $0x98] sm:$0xff]  ;;  %v39_v22 = vld [vmem:[%s1366_s1 + $0x80] sm:$0xff]  ;;  %v41_v23 = vld [vmem:[%s1366_s1 + $0x90] sm:$0xff] }
   0x9   :  { %117 = vmatpush1.msra.mxu0 %v55_v14  ;;  %194 = vmatpush1.msra.mxu1 %v57_v15  ;;  %v32_v24 = vld [vmem:[%s1366_s1 + $0x48] sm:$0xff]  ;;  %v34_v25 = vld [vmem:[%s1366_s1 + $0x58] sm:$0xff]  ;;  %v31_v26 = vld [vmem:[%s1366_s1 + $0x40] sm:$0xff] }
   0xa   :  { %118 = vmatprep.subr.mxu0 %v48_v16  ;;  %195 = vmatprep.subr.mxu1 %v50_v17  ;;  %v33_v27 = vld [vmem:[%s1366_s1 + $0x50] sm:$0xff]  ;;  %v24_v28 = vld [vmem:[%s1366_s1 + $0x8] sm:$0xff]  ;;  %v26_v29 = vld [vmem:[%s1366_s1 + $0x18] sm:$0xff] }
   0xb   :  { %119 = vmatpush1.msra.mxu0 %v47_v18  ;;  %196 = vmatpush1.msra.mxu1 %v49_v19  ;;  %v23_v30 = vld [vmem:[%s1366_s1] sm:$0xff]  ;;  %v25_v31 = vld [vmem:[%s1366_s1 + $0x10] sm:$0xff]  ;;  %v84_v33 = vld [vmem:[%s1366_s1 + $0x1e8] sm:$0xff] }
   0xc   :  { %120 = vmatprep.subr.mxu0 %v40_v20  ;;  %197 = vmatprep.subr.mxu1 %v42_v21  ;;  %v1012_v32 = vld [vmem:[%s1365_s0] sm:$0xff]  ;;  %v86_v35 = vld [vmem:[%s1366_s1 + $0x1f8] sm:$0xff]  ;;  %v85_v37 = vld [vmem:[%s1366_s1 + $0x1f0] sm:$0xff] }
   0xd   :  { %121 = vmatpush1.msra.mxu0 %v39_v22  ;;  %198 = vmatpush1.msra.mxu1 %v41_v23  ;;  %v83_v36 = vld [vmem:[%s1366_s1 + $0x1e0] sm:$0xff]  ;;  %v76_v38 = vld [vmem:[%s1366_s1 + $0x1a8] sm:$0xff]  ;;  %v78_v39 = vld [vmem:[%s1366_s1 + $0x1b8] sm:$0xff] }
   0xe   :  { %122 = vmatprep.subr.mxu0 %v32_v24  ;;  %199 = vmatprep.subr.mxu1 %v34_v25  ;;  %v75_v40 = vld [vmem:[%s1366_s1 + $0x1a0] sm:$0xff]  ;;  %v77_v41 = vld [vmem:[%s1366_s1 + $0x1b0] sm:$0xff]  ;;  %v68_v42 = vld [vmem:[%s1366_s1 + $0x168] sm:$0xff] }
   0xf   :  { %123 = vmatpush1.msra.mxu0 %v31_v26  ;;  %200 = vmatpush1.msra.mxu1 %v33_v27  ;;  %v70_v43 = vld [vmem:[%s1366_s1 + $0x178] sm:$0xff]  ;;  %v67_v44 = vld [vmem:[%s1366_s1 + $0x160] sm:$0xff]  ;;  %v69_v45 = vld [vmem:[%s1366_s1 + $0x170] sm:$0xff] }
  0x10   :  { %124 = vmatprep.subr.mxu0 %v24_v28  ;;  %201 = vmatprep.subr.mxu1 %v26_v29  ;;  %v60_v46 = vld [vmem:[%s1366_s1 + $0x128] sm:$0xff]  ;;  %v62_v47 = vld [vmem:[%s1366_s1 + $0x138] sm:$0xff]  ;;  %v59_v48 = vld [vmem:[%s1366_s1 + $0x120] sm:$0xff] }
  0x11   :  { %125 = vmatpush1.msra.mxu0 %v23_v30  ;;  %202 = vmatpush1.msra.mxu1 %v25_v31  ;;  %v61_v49 = vld [vmem:[%s1366_s1 + $0x130] sm:$0xff]  ;;  %v52_v50 = vld [vmem:[%s1366_s1 + $0xe8] sm:$0xff]  ;;  %v54_v51 = vld [vmem:[%s1366_s1 + $0xf8] sm:$0xff] }
  0x12   :  { %737 = vmatmul.mubr.msk.f32.vlgmr.msra.gmra.mxu0 %vm87_vm0, %v1012_v32  ;;  %264 = vmatprep.subr.mxu0 %v84_v33  ;;  %v51_v52 = vld [vmem:[%s1366_s1 + $0xe0] sm:$0xff]  ;;  %v53_v53 = vld [vmem:[%s1366_s1 + $0xf0] sm:$0xff]  ;;  %v1083_v54 = vld [vmem:[%s1365_s0 + $0x8] sm:$0xff] }
  0x13   :  { %341 = vmatprep.subr.mxu1 %v86_v35  ;;  %739 = vmatmul.mubr.msk.f32.vlgmr.msra.gmra.mxu1 %vm87_vm0, %v1012_v32  ;;  %v44_v55 = vld [vmem:[%s1366_s1 + $0xa8] sm:$0xff]  ;;  %v46_v56 = vld [vmem:[%s1366_s1 + $0xb8] sm:$0xff]  ;;  %v43_v57 = vld [vmem:[%s1366_s1 + $0xa0] sm:$0xff] }
  0x14   :  { %265 = vmatpush1.msra.mxu0 %v83_v36  ;;  %342 = vmatpush1.msra.mxu1 %v85_v37  ;;  %v45_v58 = vld [vmem:[%s1366_s1 + $0xb0] sm:$0xff]  ;;  %v36_v59 = vld [vmem:[%s1366_s1 + $0x68] sm:$0xff]  ;;  %v38_v60 = vld [vmem:[%s1366_s1 + $0x78] sm:$0xff] }
  0x15   :  { %266 = vmatprep.subr.mxu0 %v76_v38  ;;  %343 = vmatprep.subr.mxu1 %v78_v39  ;;  %v35_v61 = vld [vmem:[%s1366_s1 + $0x60] sm:$0xff]  ;;  %v37_v62 = vld [vmem:[%s1366_s1 + $0x70] sm:$0xff] }
  0x16   :  { %267 = vmatpush1.msra.mxu0 %v75_v40  ;;  %344 = vmatpush1.msra.mxu1 %v77_v41 }
  0x17   :  { %268 = vmatprep.subr.mxu0 %v68_v42  ;;  %345 = vmatprep.subr.mxu1 %v70_v43 }
  0x18   :  { %269 = vmatpush1.msra.mxu0 %v67_v44  ;;  %346 = vmatpush1.msra.mxu1 %v69_v45 }
  0x19   :  { %270 = vmatprep.subr.mxu0 %v60_v46  ;;  %347 = vmatprep.subr.mxu1 %v62_v47 }
  0x1a   :  { %271 = vmatpush1.msra.mxu0 %v59_v48  ;;  %348 = vmatpush1.msra.mxu1 %v61_v49 }
  0x1b   :  { %272 = vmatprep.subr.mxu0 %v52_v50  ;;  %349 = vmatprep.subr.mxu1 %v54_v51 }
  0x1c   :  { %164 = vmatprep.mubr.f32.mxu0 %v879_v34  ;;  %273 = vmatpush1.msra.mxu0 %v51_v52 }
  0x1d   :  { %350 = vmatpush1.msra.mxu1 %v53_v53  ;;  %738 = vmatmul.mubr.msk.f32.gmra.mxu0 %vm87_vm0, %v1083_v54 }
  0x1e   :  { %274 = vmatprep.subr.mxu0 %v44_v55  ;;  %351 = vmatprep.subr.mxu1 %v46_v56 }
  0x1f   :  { %241 = vmatprep.mubr.f32.mxu1 %v879_v34  ;;  %275 = vmatpush1.msra.mxu0 %v43_v57 }
  0x20   :  { %10 = vsyncpa [#allocation3], 0  ;;  %352 = vmatpush1.msra.mxu1 %v45_v58  ;;  %276 = vmatprep.subr.mxu0 %v36_v59  ;;  %v28_v63 = vld [vmem:[%s1366_s1 + $0x28] sm:$0xff]  ;;  %v30_v0 = vld [vmem:[%s1366_s1 + $0x38] sm:$0xff]  ;;  %vm718_vm1 = vcmask 130048   ;;  %s880_s29 = smov [#allocation2]  }
  0x21   :  { %740 = vmatmul.mubr.msk.f32.gmra.mxu1 %vm87_vm0, %v1083_v54  ;;  %353 = vmatprep.subr.mxu1 %v38_v60  ;;  %v27_v1 = vld [vmem:[%s1366_s1 + $0x20] sm:$0xff]  ;;  %v29_v2 = vld [vmem:[%s1366_s1 + $0x30] sm:$0xff]  ;;  %v481_v3 = vld [vmem:[%s1368_s3 + $0x38] sm:$0xff]  ;;  %s726_s30 = sshll.u32 %s880_s29, 4  ;;  %s727_s30 = int_to_ptr.vmem [resolvable:$true] %s726_s30 }
  0x22   :  { %277 = vmatpush1.msra.mxu0 %v35_v61  ;;  %354 = vmatpush1.msra.mxu1 %v37_v62  ;;  %v441_v4 = vld [vmem:[%s1367_s2 + $0xf8] sm:$0xff]  ;;  %v480_v6 = vld [vmem:[%s1368_s3 + $0x30] sm:$0xff]  ;;  %v479_v8 = vld [vmem:[%s1368_s3 + $0x28] sm:$0xff]  ;;  %s857_s6 = scalar_lea.vmem %s727_s30, 256  ;;  %p862_p1 = scmp.lt.s32.totalorder %s727_s30, %s727_s30 }
  0x23   :  { %278 = vmatprep.subr.mxu0 %v28_v63  ;;  %355 = vmatprep.subr.mxu1 %v30_v0  ;;  %v425_v5 = vld [vmem:[%s1367_s2 + $0x78] sm:$0xff]  ;;  %v440_v7 = vld [vmem:[%s1367_s2 + $0xf0] sm:$0xff]  ;;  %v439_v10 = vld [vmem:[%s1367_s2 + $0xe8] sm:$0xff]  ;;  %p858_p0 = scmp.ne.s32.totalorder %s727_s30, %s857_s6  ;;  %p863_p2 = scmp.lt.s32.totalorder %s857_s6, %s857_s6 }
  0x24   :  { %279 = vmatpush1.msra.mxu0 %v27_v1  ;;  %312 = vmatprep.mubr.f32.mxu0 %v879_v34  ;;  %v424_v9 = vld [vmem:[%s1367_s2 + $0x70] sm:$0xff]  ;;  %v478_v11 = vld [vmem:[%s1368_s3 + $0x20] sm:$0xff]  ;;  %v423_v12 = vld [vmem:[%s1367_s2 + $0x68] sm:$0xff] }
  0x25   :  { %356 = vmatpush1.msra.mxu1 %v29_v2  ;;  %389 = vmatprep.mubr.f32.mxu1 %v879_v34  ;;  %v438_v13 = vld [vmem:[%s1367_s2 + $0xe0] sm:$0xff]  ;;  %v477_v14 = vld [vmem:[%s1368_s3 + $0x18] sm:$0xff]  ;;  %v476_v17 = vld [vmem:[%s1368_s3 + $0x10] sm:$0xff]  ;;  %p864_p3 = por %p863_p2, %p862_p1 }
  0x26   :  { %741 = vmatmul.mubr.msk.f32.vlgmr.msra.gmra.mxu0 %vm87_vm0, %v1012_v32  ;;  %743 = vmatmul.mubr.msk.f32.vlgmr.msra.gmra.mxu1 %vm87_vm0, %v1012_v32  ;;  %v422_v15 = vld [vmem:[%s1367_s2 + $0x60] sm:$0xff]  ;;  %v437_v16 = vld [vmem:[%s1367_s2 + $0xd8] sm:$0xff]  ;;  %v475_v19 = vld [vmem:[%s1368_s3 + $0x8] sm:$0xff] }
  0x27   :  { %318 = vmatprep.mubr.f32.mxu0 %v879_v34  ;;  %395 = vmatprep.mubr.f32.mxu1 %v879_v34  ;;  %v421_v18 = vld [vmem:[%s1367_s2 + $0x58] sm:$0xff]  ;;  %v474_v20 = vld [vmem:[%s1368_s3] sm:$0xff]  ;;  %v472_v23 = vld [vmem:[%s1367_s2 + $0x1f0] sm:$0xff]  ;;  %p865_p4 = pnand %p864_p3, %p858_p0 }
  0x28   :  { %834 = vmatprep.subr.mxu0 %v481_v3  ;;  %758 = vmatprep.subr.mxu1 %v441_v4  ;;  %v473_v21 = vld [vmem:[%s1367_s2 + $0x1f8] sm:$0xff]  ;;  %v456_v24 = vld [vmem:[%s1367_s2 + $0x170] sm:$0xff]  ;;  %v471_v25 = vld [vmem:[%s1367_s2 + $0x1e8] sm:$0xff] }
  0x29   :  { %835 = vmatpush3.msra.mxu0 %v481_v3  ;;  %759 = vmatpush3.msra.mxu1 %v425_v5  ;;  %v457_v22 = vld [vmem:[%s1367_s2 + $0x178] sm:$0xff]  ;;  %v455_v26 = vld [vmem:[%s1367_s2 + $0x168] sm:$0xff]  ;;  %v470_v27 = vld [vmem:[%s1367_s2 + $0x1e0] sm:$0xff] }
  0x2a   :  { %742 = vmatmul.mubr.msk.f32.gmra.mxu0 %vm87_vm0, %v1083_v54  ;;  %744 = vmatmul.mubr.msk.f32.gmra.mxu1 %vm87_vm0, %v1083_v54  ;;  %v454_v28 = vld [vmem:[%s1367_s2 + $0x160] sm:$0xff]  ;;  %v469_v29 = vld [vmem:[%s1367_s2 + $0x1d8] sm:$0xff]  ;;  %v436_v31 = vld [vmem:[%s1367_s2 + $0xd0] sm:$0xff] }
  0x2b   :  { %836 = vmatprep.subr.mxu0 %v480_v6  ;;  %850 = vmatprep.mubr.msk.f32.mxu0 %vm87_vm0, %v1012_v32  ;;  %v453_v30 = vld [vmem:[%s1367_s2 + $0x158] sm:$0xff]  ;;  %v468_v32 = vld [vmem:[%s1367_s2 + $0x1d0] sm:$0xff]  ;;  %v435_v35 = vld [vmem:[%s1367_s2 + $0xc8] sm:$0xff] }
  0x2c   :  { %837 = vmatpush3.msra.mxu0 %v480_v6  ;;  %760 = vmatprep.subr.mxu1 %v440_v7  ;;  %v420_v33 = vld [vmem:[%s1367_s2 + $0x50] sm:$0xff]  ;;  %v467_v36 = vld [vmem:[%s1367_s2 + $0x1c8] sm:$0xff]  ;;  %v434_v39 = vld [vmem:[%s1367_s2 + $0xc0] sm:$0xff] }
  0x2d   :  { %838 = vmatprep.subr.mxu0 %v479_v8  ;;  %761 = vmatpush3.msra.mxu1 %v424_v9  ;;  %v452_v34 = vld [vmem:[%s1367_s2 + $0x150] sm:$0xff]  ;;  %v419_v37 = vld [vmem:[%s1367_s2 + $0x48] sm:$0xff]  ;;  %v466_v40 = vld [vmem:[%s1367_s2 + $0x1c0] sm:$0xff] }
  0x2e   :  { %839 = vmatpush3.msra.mxu0 %v479_v8  ;;  %762 = vmatprep.subr.mxu1 %v439_v10  ;;  %v451_v38 = vld [vmem:[%s1367_s2 + $0x148] sm:$0xff]  ;;  %v418_v41 = vld [vmem:[%s1367_s2 + $0x40] sm:$0xff]  ;;  %v433_v43 = vld [vmem:[%s1367_s2 + $0xb8] sm:$0xff] }
  0x2f   :  { %840 = vmatprep.subr.mxu0 %v478_v11  ;;  %763 = vmatpush3.msra.mxu1 %v423_v12  ;;  %v450_v42 = vld [vmem:[%s1367_s2 + $0x140] sm:$0xff]  ;;  %v465_v44 = vld [vmem:[%s1367_s2 + $0x1b8] sm:$0xff]  ;;  %v432_v47 = vld [vmem:[%s1367_s2 + $0xb0] sm:$0xff] }
  0x30   :  { %841 = vmatpush3.msra.mxu0 %v478_v11  ;;  %764 = vmatprep.subr.mxu1 %v438_v13  ;;  %v417_v45 = vld [vmem:[%s1367_s2 + $0x38] sm:$0xff]  ;;  %v464_v48 = vld [vmem:[%s1367_s2 + $0x1b0] sm:$0xff]  ;;  %v431_v51 = vld [vmem:[%s1367_s2 + $0xa8] sm:$0xff] }
  0x31   :  { %842 = vmatprep.subr.mxu0 %v477_v14  ;;  %765 = vmatpush3.msra.mxu1 %v422_v15  ;;  %v449_v46 = vld [vmem:[%s1367_s2 + $0x138] sm:$0xff]  ;;  %v416_v49 = vld [vmem:[%s1367_s2 + $0x30] sm:$0xff]  ;;  %v463_v52 = vld [vmem:[%s1367_s2 + $0x1a8] sm:$0xff] }
  0x32   :  { %843 = vmatpush3.msra.mxu0 %v477_v14  ;;  %766 = vmatprep.subr.mxu1 %v437_v16  ;;  %v448_v50 = vld [vmem:[%s1367_s2 + $0x130] sm:$0xff]  ;;  %v415_v53 = vld [vmem:[%s1367_s2 + $0x28] sm:$0xff]  ;;  %v430_v55 = vld [vmem:[%s1367_s2 + $0xa0] sm:$0xff] }
  0x33   :  { %844 = vmatprep.subr.mxu0 %v476_v17  ;;  %767 = vmatpush3.msra.mxu1 %v421_v18  ;;  %v462_v56 = vld [vmem:[%s1367_s2 + $0x1a0] sm:$0xff]  ;;  %v429_v59 = vld [vmem:[%s1367_s2 + $0x98] sm:$0xff]  ;;  %v428_v63 = vld [vmem:[%s1367_s2 + $0x90] sm:$0xff] }
  0x34   :  { %845 = vmatpush3.msra.mxu0 %v476_v17  ;;  %768 = vmatprep.subr.mxu1 %v436_v31  ;;  %v414_v57 = vld [vmem:[%s1367_s2 + $0x20] sm:$0xff]  ;;  %v461_v60 = vld [vmem:[%s1367_s2 + $0x198] sm:$0xff]  ;;  %v460_v0 = vld [vmem:[%s1367_s2 + $0x190] sm:$0xff] }
  0x35   :  { %846 = vmatprep.subr.mxu0 %v475_v19  ;;  %769 = vmatpush3.msra.mxu1 %v420_v33  ;;  %v446_v58 = vld [vmem:[%s1367_s2 + $0x120] sm:$0xff]  ;;  %v413_v61 = vld [vmem:[%s1367_s2 + $0x18] sm:$0xff]  ;;  %v412_v1 = vld [vmem:[%s1367_s2 + $0x10] sm:$0xff] }
  0x36   :  { %847 = vmatpush3.msra.mxu0 %v475_v19  ;;  %770 = vmatprep.subr.mxu1 %v435_v35  ;;  %v445_v62 = vld [vmem:[%s1367_s2 + $0x118] sm:$0xff]  ;;  %v444_v2 = vld [vmem:[%s1367_s2 + $0x110] sm:$0xff]  ;;  %v427_v3 = vld [vmem:[%s1367_s2 + $0x88] sm:$0xff] }
  0x37   :  { %848 = vmatprep.subr.mxu0 %v474_v20  ;;  %771 = vmatpush3.msra.mxu1 %v419_v37  ;;  %v459_v4 = vld [vmem:[%s1367_s2 + $0x188] sm:$0xff]  ;;  %v426_v7 = vld [vmem:[%s1367_s2 + $0x80] sm:$0xff] }
  0x38   :  { %849 = vmatpush3.msra.mxu0 %v474_v20  ;;  %772 = vmatprep.subr.mxu1 %v434_v39  ;;  %v411_v5 = vld [vmem:[%s1367_s2 + $0x8] sm:$0xff]  ;;  %v458_v8 = vld [vmem:[%s1367_s2 + $0x180] sm:$0xff] }
  0x39   :  { %796 = vmatprep.subr.mxu0 %v473_v21  ;;  %851 = vmatmul.mubr.msk.f32.vlgmr.msra.gmra.mxu0 %vm87_vm0, %v1083_v54  ;;  %v447_v54 = vld [vmem:[%s1367_s2 + $0x128] sm:$0xff]  ;;  %v410_v9 = vld [vmem:[%s1367_s2] sm:$0xff] }
  0x3a   :  { %797 = vmatpush3.msra.mxu0 %v457_v22  ;;  %773 = vmatpush3.msra.mxu1 %v418_v41  ;;  %v443_v6 = vld [vmem:[%s1367_s2 + $0x108] sm:$0xff]  ;;  %v442_v10 = vld [vmem:[%s1367_s2 + $0x100] sm:$0xff] }
  0x3b   :  { %798 = vmatprep.subr.mxu0 %v472_v23  ;;  %774 = vmatprep.subr.mxu1 %v433_v43 }
  0x3c   :  { %799 = vmatpush3.msra.mxu0 %v456_v24  ;;  %775 = vmatpush3.msra.mxu1 %v417_v45 }
  0x3d   :  { %800 = vmatprep.subr.mxu0 %v471_v25  ;;  %776 = vmatprep.subr.mxu1 %v432_v47 }
  0x3e   :  { %801 = vmatpush3.msra.mxu0 %v455_v26  ;;  %777 = vmatpush3.msra.mxu1 %v416_v49 }
  0x3f   :  { %802 = vmatprep.subr.mxu0 %v470_v27  ;;  %778 = vmatprep.subr.mxu1 %v431_v51 }
  0x40   :  { %803 = vmatpush3.msra.mxu0 %v454_v28  ;;  %779 = vmatpush3.msra.mxu1 %v415_v53 }
  0x41   :  { %804 = vmatprep.subr.mxu0 %v469_v29  ;;  %780 = vmatprep.subr.mxu1 %v430_v55 }
  0x42   :  { %805 = vmatpush3.msra.mxu0 %v453_v30  ;;  %781 = vmatpush3.msra.mxu1 %v414_v57 }
  0x43   :  { %806 = vmatprep.subr.mxu0 %v468_v32  ;;  %782 = vmatprep.subr.mxu1 %v429_v59 }
  0x44   :  { %807 = vmatpush3.msra.mxu0 %v452_v34  ;;  %783 = vmatpush3.msra.mxu1 %v413_v61 }
  0x45   :  { %808 = vmatprep.subr.mxu0 %v467_v36  ;;  %784 = vmatprep.subr.mxu1 %v428_v63 }
  0x46   :  { %809 = vmatpush3.msra.mxu0 %v451_v38  ;;  %785 = vmatpush3.msra.mxu1 %v412_v1 }
  0x47   :  { %810 = vmatprep.subr.mxu0 %v466_v40  ;;  %786 = vmatprep.subr.mxu1 %v427_v3 }
  0x48   :  { %811 = vmatpush3.msra.mxu0 %v450_v42  ;;  %787 = vmatpush3.msra.mxu1 %v411_v5 }
  0x49   :  { %812 = vmatprep.subr.mxu0 %v465_v44  ;;  %788 = vmatprep.subr.mxu1 %v426_v7 }
  0x4a   :  { %813 = vmatpush3.msra.mxu0 %v449_v46  ;;  %789 = vmatpush3.msra.mxu1 %v410_v9  ;;  %v747_v46 = vld [vmem:[%s1369_s4] ss:$0 sm:$0xff] }
  0x4b   :  { %814 = vmatprep.subr.mxu0 %v464_v48 }
  0x4c   :  { %815 = vmatpush3.msra.mxu0 %v448_v50 }
  0x4d   :  { %816 = vmatprep.subr.mxu0 %v463_v52 }
  0x4e   :  { %817 = vmatpush3.msra.mxu0 %v447_v54 }
  0x4f   :  { %818 = vmatprep.subr.mxu0 %v462_v56 }
  0x50   :  { %819 = vmatpush3.msra.mxu0 %v446_v58 }
  0x51   :  { %820 = vmatprep.subr.mxu0 %v461_v60 }
  0x52   :  { %821 = vmatpush3.msra.mxu0 %v445_v62 }
  0x53   :  { %822 = vmatprep.subr.mxu0 %v460_v0 }
  0x54   :  { %823 = vmatpush3.msra.mxu0 %v444_v2 }
  0x55   :  { %824 = vmatprep.subr.mxu0 %v459_v4 }
  0x56   :  { %825 = vmatpush3.msra.mxu0 %v443_v6 }
  0x57   :  { %826 = vmatprep.subr.mxu0 %v458_v8 }
  0x58   :  { %827 = vmatpush3.msra.mxu0 %v442_v10 }
  0xd2   :  { %v160_v11 = vpop.f32.mrf.mxu0 }
  0xd3   :  { %v237_v12 = vpop.f32.mrf.mxu1 }
  0xd4   :  { %v162_v13 = vpop.f32.mrf.mxu0 }
  0xd5   :  { %v239_v14 = vpop.f32.mrf.mxu1 }
  0xdd   :  { %v166_v15 = vpop.f32.mrf.mxu0 }
  0xdf   :  { %v168_v18 = vpop.f32.mrf.mxu0 }
  0xe1   :  { %v243_v16 = vpop.f32.mrf.mxu1 }
  0xe3   :  { %v245_v17 = vpop.f32.mrf.mxu1 }
  0xe6   :  { %v314_v19 = vpop.f32.mrf.mxu0  ;;  %v391_v20 = vpop.f32.mrf.mxu1 }
  0xe7   :  { %v402_v25 = vmul.f32 %v314_v19, %v160_v11  ;;  %v404_v26 = vmul.f32 %v391_v20, %v237_v12 }
  0xe8   :  { %v316_v21 = vpop.f32.mrf.mxu0  ;;  %v393_v22 = vpop.f32.mrf.mxu1 }
  0xe9   :  { %v403_v23 = vmul.f32 %v316_v21, %v162_v13  ;;  %v405_v24 = vmul.f32 %v393_v22, %v239_v14 }
  0xea   :  { %v320_v27 = vpop.f32.mrf.mxu0  ;;  %v397_v28 = vpop.f32.mrf.mxu1 }
  0xeb   :  { %621 = vmatprep.mubr.f32.mxu1 %v403_v23  ;;  %696 = vmatprep.mubr.f32.mxu0 %v405_v24  ;;  %v406_v33 = vmul.f32 %v320_v27, %v166_v15  ;;  %v408_v34 = vmul.f32 %v397_v28, %v243_v16 }
  0xec   :  { %v322_v29 = vpop.f32.mrf.mxu0  ;;  %v399_v30 = vpop.f32.mrf.mxu1  ;;  %622 = vmatmul.mubr.f32.vlgmr.msra.gmra.mxu1 %v402_v25  ;;  %697 = vmatmul.mubr.f32.vlgmr.msra.gmra.mxu0 %v404_v26 }
  0xed   :  { %v407_v31 = vmul.f32 %v322_v29, %v168_v18  ;;  %v409_v32 = vmul.f32 %v399_v30, %v245_v17 }
  0xef   :  { %626 = vmatprep.mubr.f32.mxu1 %v407_v31  ;;  %701 = vmatprep.mubr.f32.mxu0 %v409_v32 }
  0xf0   :  { %627 = vmatmul.mubr.f32.gmra.mxu1 %v406_v33  ;;  %702 = vmatmul.mubr.f32.gmra.mxu0 %v408_v34 }
  0xf9   :  { %v852_v35 = vpop.f32.mrf.mxu0 }
  0xfb   :  { %v548_v36 = vpop.f32.mrf.mxu0 }
 0x1ac   :  { %v790_v37 = vpop.f32.mrf.mxu1  ;;  %v828_v38 = vpop.f32.mrf.mxu0 }
 0x1ae   :  { %v791_v39 = vpop.f32.mrf.mxu1  ;;  %v829_v40 = vpop.f32.mrf.mxu0 }
 0x1af   :  { %v792_v41 = vadd.f32 %v791_v39, %v790_v37  ;;  %v830_v45 = vadd.f32 %v829_v40, %v828_v38 }
 0x1b0   :  { %v793_v42 = vpop.f32.mrf.mxu1  ;;  %v831_v43 = vpop.f32.mrf.mxu0 }
 0x1b1   :  { %v624_v44 = vadd.f32 %v792_v41, %v548_v36 }
 0x1b2   :  { %v794_v47 = vpop.f32.mrf.mxu1  ;;  %v832_v48 = vpop.f32.mrf.mxu0 }
 0x1b3   :  { %v699_v49 = vadd.f32 %v830_v45, %v624_v44  ;;  %v795_v50 = vadd.f32 %v794_v47, %v793_v42  ;;  %v833_v53 = vadd.f32 %v832_v48, %v831_v43 }
 0x1b5   :  { %v714_v51 = vadd.f32 %v747_v46, %v699_v49  ;;  %v629_v52 = vadd.f32 %v852_v35, %v795_v50 }
 0x1b7   :  { %v716_v54 = vmax.f32 %v714_v51, 0.0  ;;  %v704_v55 = vadd.f32 %v833_v53, %v629_v52 }
 0x1b9   :  { %719 = vst.msk [vmem:[#allocation2] sm:$0xff] %vm718_vm1, %v716_v54  ;;  %v715_v56 = vadd.f32 %v747_v46, %v704_v55 }
 0x1bb   :  { %v717_v57 = vmax.f32 %v715_v56, 0.0 }
 0x1bd   :  { %720 = vst.msk [vmem:[#allocation2 + $0x8] sm:$0xff] %vm718_vm1, %v717_v57 }
 0x1be   :  { %868 = shalt.err (!%p865_p4)
}
 0x1bf   :  { %s881_s4 = smov 128   ;;  %s882_s0 = smov 8  }
 0x1c0   :  { %732 = dma.vmem_to_hbm [thread:$0]  %s727_s30, 256, %s1370_s5, [#allocation3], %s881_s4, %s881_s4, %s882_s0  }
 0x1c1   :  { %877 = dma.done.wait [#allocation3], 256  }
 0x1c2   :  { %878 = vsyncadd [#allocation3], 4294967040 }
 0x1c3   :  { %736 = vsyncpa [#allocation3], 1 }

</bundles_post_ra>
